<compile_context>
chip_gen: v7x
topology: tpu7x:2x2x1
jax: 0.10.0
libtpu: 0.0.40
codegen_flags: <defaults>
</compile_context>

<pallas_src>
import functools

import jax
import jax.numpy as jnp
from jax.experimental import pallas as pl
from jax.experimental.pallas import tpu as pltpu


def _label_smoothing_kernel(pred_ref, tgt_ref, out_ref, *, smoothing, confidence):
    """One grid step: a (TM, C) tile of logits -> (TM, 1) per-row losses.

    row_loss = lse - (smoothing/C) * sum_c(z) - confidence * z[target]
    where z = x - max(x), lse = log(sum_c exp(z)).  (Equivalent to
    -sum_c true_dist * log_softmax(x), since smoothing + confidence == 1.)
    """
    x = pred_ref[...].astype(jnp.float32)                       # (TM, C)
    tm, c = x.shape

    m = jnp.max(x, axis=-1, keepdims=True)                      # (TM, 1)
    z = x - m                                                   # (TM, C)
    lse = jnp.log(jnp.sum(jnp.exp(z), axis=-1, keepdims=True))  # (TM, 1)

    tgt = tgt_ref[...]                                          # (TM, 1) int32
    classes = jax.lax.broadcasted_iota(jnp.int32, (tm, c), 1)
    z_t = jnp.sum(jnp.where(classes == tgt, z, jnp.float32(0.0)),
                  axis=-1, keepdims=True)                       # (TM, 1)
    z_sum = jnp.sum(z, axis=-1, keepdims=True)                  # (TM, 1)

    out_ref[...] = (lse
                    - jnp.float32(smoothing / c) * z_sum
                    - jnp.float32(confidence) * z_t)


def _round_up(a, b):
    return ((a + b - 1) // b) * b


def label_smoothing_loss(pred, target, smoothing=0.1, *, block_rows=256):
    """pred: (N, C) float (f32 or bf16 -- do NOT upcast before calling),
    target: (N,) int.  Returns scalar f32 loss."""
    n, c = pred.shape
    confidence = 1.0 - smoothing

    # Tile rows: as large as requested, but cap the f32 compute tile at ~4 MiB
    # per buffer (safe for v7x's smaller VMEM), keep a multiple of 8 sublanes,
    # and never exceed the (sublane-rounded) row count.
    cap_rows = max(8, (4 * 1024 * 1024) // (c * 4))
    tm = int(min(block_rows, cap_rows, _round_up(n, 8)))
    tm = max(8, (tm // 8) * 8)

    n_pad = _round_up(n, tm)
    if n_pad != n:
        pred = jnp.pad(pred, ((0, n_pad - n), (0, 0)))
        target = jnp.pad(target, (0, n_pad - n))

    tgt2d = target.astype(jnp.int32).reshape(n_pad, 1)
    num_tiles = n_pad // tm

    kernel = functools.partial(
        _label_smoothing_kernel,
        smoothing=float(smoothing),
        confidence=float(confidence),
    )

    per_row = pl.pallas_call(
        kernel,
        out_shape=jax.ShapeDtypeStruct((n_pad, 1), jnp.float32),
        grid_spec=pltpu.PrefetchScalarGridSpec(
            num_scalar_prefetch=0,
            grid=(num_tiles,),
            in_specs=[
                pl.BlockSpec((tm, c), lambda i: (i, 0)),
                pl.BlockSpec((tm, 1), lambda i: (i, 0)),
            ],
            out_specs=pl.BlockSpec((tm, 1), lambda i: (i, 0)),
        ),
        compiler_params=pltpu.CompilerParams(
            dimension_semantics=("parallel",),          # independent tiles -> 2 TCs on v7x
            vmem_limit_bytes=32 * 1024 * 1024,          # raise v5e's 16 MiB default
        ),
    )(pred, tgt2d)

    # Drop padded rows and take the mean over the true N rows in plain JAX.
    return jnp.sum(per_row[:n, 0]) / jnp.float32(n)


def _reference(pred, target, smoothing=0.1):
    """Plain-JAX reference mirroring the PyTorch module."""
    confidence = 1.0 - smoothing
    logp = jax.nn.log_softmax(pred.astype(jnp.float32), axis=-1)
    c = pred.shape[-1]
    onehot = jax.nn.one_hot(target, c, dtype=jnp.float32)
    true_dist = smoothing / c + confidence * onehot
    return jnp.mean(jnp.sum(-true_dist * logp, axis=-1))


if __name__ == "__main__":
    key = jax.random.PRNGKey(0)
    k1, k2, k3, k4 = jax.random.split(key, 4)
    smoothing = 0.1

    # Case 1: small f32 logits, divisible row count.
    N1, C1 = 16, 32
    pred1 = jax.random.normal(k1, (N1, C1), dtype=jnp.float32)
    tgt1 = jax.random.randint(k2, (N1,), 0, C1, dtype=jnp.int32)
    loss1 = jax.block_until_ready(label_smoothing_loss(pred1, tgt1, smoothing))
    ref1 = _reference(pred1, tgt1, smoothing)
    assert jnp.allclose(loss1, ref1, rtol=1e-5, atol=1e-5), (loss1, ref1)

    # Case 2: bf16 logits, N not divisible by the tile size (exercises padding
    # + multi-tile parallel grid).
    N2, C2 = 50, 96
    pred2 = jax.random.normal(k3, (N2, C2), dtype=jnp.bfloat16)
    tgt2 = jax.random.randint(k4, (N2,), 0, C2, dtype=jnp.int32)
    loss2 = jax.block_until_ready(
        label_smoothing_loss(pred2, tgt2, smoothing, block_rows=16))
    ref2 = _reference(pred2, tgt2, smoothing)
    assert jnp.allclose(loss2, ref2, rtol=1e-4, atol=1e-4), (loss2, ref2)

    print("KERNEL_OK")
</pallas_src>

<mosaic_0001>
module attributes {stable_mosaic.version = 11 : i64} {
  func.func @_label_smoothing_kernel(%arg0: i32, %arg1: memref<16x32xf32, #tpu.memory_space<vmem>>, %arg2: memref<16x1xi32, #tpu.memory_space<vmem>>, %arg3: memref<16x1xf32, #tpu.memory_space<vmem>>) attributes {dimension_semantics = [#tpu.dimension_semantics<parallel>], iteration_bounds = array<i64: 1>, scalar_prefetch = 0 : i64, scratch_operands = 0 : i64, tpu.core_type = #tpu.core_type<tc>, window_params = [{transform_indices = @transform_0, window_bounds = array<i64: 16, 32>}, {transform_indices = @transform_1, window_bounds = array<i64: 16, 1>}, {transform_indices = @transform_2, window_bounds = array<i64: 16, 1>}]} {
    %c0 = arith.constant 0 : index
    %c0_0 = arith.constant 0 : index
    %0 = vector.load %arg1[%c0, %c0_0] : memref<16x32xf32, #tpu.memory_space<vmem>>, vector<16x32xf32>
    %cst = arith.constant dense<0xFF800000> : vector<16xf32>
    %1 = vector.multi_reduction <maximumf>, %0, %cst [1] : vector<16x32xf32> to vector<16xf32>
    %2 = vector.shape_cast %1 : vector<16xf32> to vector<16x1xf32>
    %3 = vector.broadcast %2 : vector<16x1xf32> to vector<16x32xf32>
    %4 = arith.subf %0, %3 : vector<16x32xf32>
    %5 = math.exp %4 : vector<16x32xf32>
    %cst_1 = arith.constant dense<0.000000e+00> : vector<16xf32>
    %6 = vector.multi_reduction <add>, %5, %cst_1 [1] : vector<16x32xf32> to vector<16xf32>
    %7 = vector.shape_cast %6 : vector<16xf32> to vector<16x1xf32>
    %8 = math.log %7 : vector<16x1xf32>
    %c0_2 = arith.constant 0 : index
    %c0_3 = arith.constant 0 : index
    %9 = vector.load %arg2[%c0_2, %c0_3] : memref<16x1xi32, #tpu.memory_space<vmem>>, vector<16x1xi32>
    %10 = tpu.iota {dimensions = array<i32: 1>} : vector<16x32xi32>
    %11 = vector.broadcast %9 : vector<16x1xi32> to vector<16x32xi32>
    %12 = arith.cmpi eq, %10, %11 : vector<16x32xi32>
    %cst_4 = arith.constant 0.000000e+00 : f32
    %13 = vector.broadcast %cst_4 : f32 to vector<16x32xf32>
    %14 = arith.select %12, %4, %13 : vector<16x32xi1>, vector<16x32xf32>
    %cst_5 = arith.constant dense<0.000000e+00> : vector<16xf32>
    %15 = vector.multi_reduction <add>, %14, %cst_5 [1] : vector<16x32xf32> to vector<16xf32>
    %16 = vector.shape_cast %15 : vector<16xf32> to vector<16x1xf32>
    %cst_6 = arith.constant dense<0.000000e+00> : vector<16xf32>
    %17 = vector.multi_reduction <add>, %4, %cst_6 [1] : vector<16x32xf32> to vector<16xf32>
    %18 = vector.shape_cast %17 : vector<16xf32> to vector<16x1xf32>
    %cst_7 = arith.constant 3.125000e-03 : f32
    %19 = vector.broadcast %cst_7 : f32 to vector<16x1xf32>
    %20 = arith.mulf %19, %18 : vector<16x1xf32>
    %21 = arith.subf %8, %20 : vector<16x1xf32>
    %cst_8 = arith.constant 0.899999976 : f32
    %22 = vector.broadcast %cst_8 : f32 to vector<16x1xf32>
    %23 = arith.mulf %22, %16 : vector<16x1xf32>
    %24 = arith.subf %21, %23 : vector<16x1xf32>
    %c0_9 = arith.constant 0 : index
    %c0_10 = arith.constant 0 : index
    %25 = vector.load %arg3[%c0_9, %c0_10] : memref<16x1xf32, #tpu.memory_space<vmem>>, vector<16x1xf32>
    tpu.vector_store %arg3[%c0_9, %c0_10], %24 {strides = array<i32>} : memref<16x1xf32, #tpu.memory_space<vmem>>, vector<16x1xf32>,
    return
  }
  func.func @transform_0(%arg0: i32) -> (i32, i32) {
    %c0_i32 = arith.constant 0 : i32
    %c0_i32_0 = arith.constant 0 : i32
    return %arg0, %c0_i32 : i32, i32
  }
  func.func @transform_1(%arg0: i32) -> (i32, i32) {
    %c0_i32 = arith.constant 0 : i32
    %c0_i32_0 = arith.constant 0 : i32
    return %arg0, %c0_i32 : i32, i32
  }
  func.func @transform_2(%arg0: i32) -> (i32, i32) {
    %c0_i32 = arith.constant 0 : i32
    %c0_i32_0 = arith.constant 0 : i32
    return %arg0, %c0_i32 : i32, i32
  }
}

</mosaic_0001>

<bundles_post_ra>
// kernel: tpu_custom_call.1
= control target key start
LH: loop header
LB: loop body
LE: loop exit
PB: predicated region body
PF: predicated region fallthrough
CT: control target
= control target key end

     0   :  { %vm13_vm0 = vcmask 261120   ;;  %v88_v2 = vmov 0   ;;  %v38_v13 = vlaneseq  ;;  %vm70_vm3 = vcmask 7168   ;;  %s130_s0 = inlined_call_operand.vmem [shape: f32[16,32], index: 0, kind: input, shape index: {}]   ;;  %s131_s1 = inlined_call_operand.vmem [shape: s32[16,1], index: 1, kind: input, shape index: {}]   ;;  %s132_s2 = inlined_call_operand.vmem [shape: f32[16,1], index: 2, kind: output, shape index: {}]  }
   0x1   :  { %v11_v0 = vld [vmem:[%s130_s0] sm:$0xff]  ;;  %v12_v1 = vld [vmem:[%s130_s0 + $0x8] sm:$0xff]  ;;  %78 = vset.pattern.permute.xlu1 %v88_v2  ;;  %79 = vset.pattern.permute.xlu0 %v88_v2 }
   0x2   :  { %v36_v3 = vld [vmem:[%s131_s1] sm:$0xff]  ;;  %v14_v4 = vsel %vm13_vm0, %v11_v0, -inf  ;;  %v37_v5 = vld [vmem:[%s131_s1 + $0x8] sm:$0xff]  ;;  %v17_v6 = vsel %vm13_vm0, %v12_v1, -inf  ;;  %v39_v17 = vand.u32 127, %v38_v13 }
   0x3   :  { %41 = vperm.xlu1 %78, %v36_v3   ;;  %15 = vmax.xlane.f32.xlu0 %v14_v4 }
   0x7   :  { %44 = vperm.xlu1 %78, %v37_v5   ;;  %18 = vmax.xlane.f32.xlu0 %v17_v6 }
  0x82   :  { %v42_v16 = vpop.permute.xlu1 %41 }
  0x83   :  { %vm46_vm1 = vcmp.eq.s32.totalorder %v39_v17, %v42_v16 }
  0x86   :  { %v45_v21 = vpop.permute.xlu1 %44 }
  0x87   :  { %vm47_vm2 = vcmp.eq.s32.totalorder %v39_v17, %v45_v21 }
  0x90   :  { %v16_v7 = vpop.xlane.xlu0 %15 }
  0x91   :  { %v20_v8 = vsub.f32 %v11_v0, %v16_v7 }
  0x93   :  { %v22_v9 = vmul.f32 1.442695, %v20_v8  ;;  %v56_v19 = vsel %vm13_vm0, %v20_v8, 0.0  ;;  %v48_v23 = vsel %vm46_vm1, %v20_v8, 0.0 }
  0x94   :  { %v19_v10 = vpop.xlane.xlu0 %18  ;;  %v50_v24 = vsel %vm13_vm0, %v48_v23, 0.0 }
  0x95   :  { %80 = vpow2.f32 %v22_v9  ;;  %v21_v11 = vsub.f32 %v12_v1, %v19_v10 }
  0x97   :  { %v24_v12 = vmul.f32 1.442695, %v21_v11  ;;  %v59_v22 = vsel %vm13_vm0, %v21_v11, 0.0  ;;  %v49_v25 = vsel %vm47_vm2, %v21_v11, 0.0 }
  0x98   :  { %v53_v26 = vsel %vm13_vm0, %v49_v25, 0.0 }
  0x99   :  { %82 = vpow2.f32 %v24_v12 }
  0x9f   :  { %v81_v14 = vpop.eup %80 }
  0xa0   :  { %v26_v15 = vsel %vm13_vm0, %v81_v14, 0.0 }
  0xa1   :  { %27 = vadd.xlane.f32.xlu0 %v26_v15 }
  0xa3   :  { %v83_v18 = vpop.eup %82 }
  0xa4   :  { %v29_v20 = vsel %vm13_vm0, %v83_v18, 0.0 }
  0xa5   :  { %57 = vadd.xlane.f32.xlu0 %v56_v19  ;;  %30 = vadd.xlane.f32.xlu1 %v29_v20 }
  0xa9   :  { %60 = vadd.xlane.f32.xlu0 %v59_v22 }
  0xad   :  { %51 = vadd.xlane.f32.xlu0 %v50_v24 }
  0xb1   :  { %54 = vadd.xlane.f32.xlu0 %v53_v26 }
 0x12e   :  { %v28_v27 = vpop.xlane.xlu0 %27 }
 0x12f   :  { %84 = vlog2.f32 %v28_v27 }
 0x132   :  { %v31_v28 = vpop.xlane.xlu1 %30  ;;  %v58_v29 = vpop.xlane.xlu0 %57 }
 0x133   :  { %86 = vlog2.f32 %v31_v28  ;;  %v62_v33 = vmul.f32 0.003125, %v58_v29 }
 0x136   :  { %v61_v30 = vpop.xlane.xlu0 %60 }
 0x137   :  { %v63_v39 = vmul.f32 0.003125, %v61_v30 }
 0x139   :  { %v85_v31 = vpop.eup %84 }
 0x13a   :  { %v33_v32 = vmul.f32 0.6931472, %v85_v31  ;;  %v52_v34 = vpop.xlane.xlu0 %51 }
 0x13b   :  { %v66_v35 = vmul.f32 0.9, %v52_v34 }
 0x13c   :  { %v64_v36 = vsub.f32 %v33_v32, %v62_v33 }
 0x13d   :  { %v87_v37 = vpop.eup %86 }
 0x13e   :  { %v35_v38 = vmul.f32 0.6931472, %v87_v37  ;;  %v68_v40 = vsub.f32 %v64_v36, %v66_v35  ;;  %v55_v41 = vpop.xlane.xlu0 %54 }
 0x13f   :  { %v67_v42 = vmul.f32 0.9, %v55_v41 }
 0x140   :  { %v65_v43 = vsub.f32 %v35_v38, %v63_v39  ;;  %71 = vst.msk [vmem:[%s132_s2] sm:$0xff] %vm70_vm3, %v68_v40 }
 0x142   :  { %v69_v44 = vsub.f32 %v65_v43, %v67_v42 }
 0x144   :  { %72 = vst.msk [vmem:[%s132_s2 + $0x8] sm:$0xff] %vm70_vm3, %v69_v44 }

</bundles_post_ra>
